<compile_context>
chip_gen: v7x
topology: tpu7x:2x2x1
jax: 0.10.0
libtpu: 0.0.40
codegen_flags: <defaults>
</compile_context>

<pallas_src>
import functools

import jax
import jax.numpy as jnp
from jax import lax
from jax.experimental import pallas as pl
from jax.experimental.pallas import tpu as pltpu

_LANES = 128


def _round_up(x, m):
    return ((x + m - 1) // m) * m


def _focal_weight(one_minus, gamma):
    g = float(gamma)
    if g == 2.0:
        return one_minus * one_minus            # single VPU multiply
    if g == float(int(g)) and g >= 0.0:
        return one_minus ** int(g)              # integer_pow -> multiplies
    return one_minus ** jnp.float32(g)          # general (clamped) path


# ----------------------------------------------------------------------------
# Small-C path: lane-dense layout (C, tm, 128); unrolled class loop.
# ----------------------------------------------------------------------------
def _focal_small_c_kernel(preds_ref, labels_ref, at_ref, out_ref, *,
                          C, gamma, total_n):
    i = pl.program_id(0)
    labels = labels_ref[...]                    # (tm, 128) int32
    a_t = at_ref[...]                           # (tm, 128) f32
    tm, L = labels.shape

    # Running max over classes — all elementwise on dense (tm, 128) vregs.
    m = preds_ref[0].astype(jnp.float32)
    for c in range(1, C):
        m = jnp.maximum(m, preds_ref[c].astype(jnp.float32))

    # Sum of exp and gather of `shifted` at the label — still fully dense,
    # no cross-lane reductions anywhere.
    s = jnp.zeros((tm, L), jnp.float32)
    shifted_t = jnp.zeros((tm, L), jnp.float32)
    for c in range(C):
        sc = preds_ref[c].astype(jnp.float32) - m
        s = s + jnp.exp(sc)
        shifted_t = jnp.where(labels == c, sc, shifted_t)

    logp_t = shifted_t - jnp.log(s)             # log-softmax at the label only
    p_t = jnp.exp(logp_t)
    one_minus = jnp.maximum(1.0 - p_t, 0.0)     # softmax-rounding safety clamp
    loss = -a_t * _focal_weight(one_minus, gamma) * logp_t

    # Mask padded samples (pad is zeros -> finite values; mask BEFORE sum).
    row = lax.broadcasted_iota(jnp.int32, (tm, L), 0)
    lane = lax.broadcasted_iota(jnp.int32, (tm, L), 1)
    flat = (i * tm + row) * L + lane
    loss = jnp.where(flat < total_n, loss, 0.0)

    # Per-lane column sums -> (1, 1, 128); final 128-way reduce done by XLA.
    out_ref[...] = jnp.sum(loss, axis=0).reshape(1, 1, L)


def _focal_small_c(preds2d, labels1d, a_t1d, C, N, gamma, tile_rows,
                   vmem_budget_bytes, vmem_limit_bytes):
    itemsize = jnp.dtype(preds2d.dtype).itemsize
    M = pl.cdiv(N, _LANES)                      # number of 128-sample rows

    tm = tile_rows
    if tm is None:
        bytes_per_row = (2 * C * _LANES * itemsize   # preds, double-buffered
                         + 2 * 2 * _LANES * 4        # labels + a_t, double-buffered
                         + 8 * _LANES * 4)           # f32 in-kernel temporaries
        tm = vmem_budget_bytes // bytes_per_row
        tm = max(8, min(1024, (tm // 8) * 8))
    tm = max(8, (min(tm, _round_up(M, 8)) // 8) * 8)
    # v7x megacore: prefer >= 2 tiles when there is enough data (no-op on 1-TC chips).
    if M > 2 * 8:
        tm = min(tm, _round_up(pl.cdiv(M, 2), 8))

    num_tiles = pl.cdiv(M, tm)
    M_pad = num_tiles * tm
    N_pad = M_pad * _LANES

    # Wrapper-side layout plumbing: class-major, lane-dense, zero-padded.
    preds_cls = jnp.pad(jnp.transpose(preds2d), ((0, 0), (0, N_pad - N)))
    preds_cls = preds_cls.reshape(C, M_pad, _LANES)
    labels_ln = jnp.pad(labels1d, (0, N_pad - N)).reshape(M_pad, _LANES)
    a_t_ln = jnp.pad(a_t1d, (0, N_pad - N)).reshape(M_pad, _LANES)

    kernel = functools.partial(_focal_small_c_kernel, C=C,
                               gamma=float(gamma), total_n=N)

    partials = pl.pallas_call(
        kernel,
        out_shape=jax.ShapeDtypeStruct((num_tiles, 1, _LANES), jnp.float32),
        grid_spec=pltpu.PrefetchScalarGridSpec(
            num_scalar_prefetch=0,
            grid=(num_tiles,),
            in_specs=[
                pl.BlockSpec((C, tm, _LANES), lambda i: (0, i, 0)),   # preds
                pl.BlockSpec((tm, _LANES), lambda i: (i, 0)),         # labels
                pl.BlockSpec((tm, _LANES), lambda i: (i, 0)),         # alpha[label]
            ],
            out_specs=pl.BlockSpec((1, 1, _LANES), lambda i: (i, 0, 0)),
        ),
        compiler_params=pltpu.CompilerParams(
            dimension_semantics=("parallel",),
            vmem_limit_bytes=vmem_limit_bytes,
        ),
    )(preds_cls, labels_ln, a_t_ln)

    return jnp.sum(partials)


# ----------------------------------------------------------------------------
# Large-C path: row-on-sublane (tm, C) tiles.
# ----------------------------------------------------------------------------
def _focal_large_c_kernel(preds_ref, labels_ref, at_ref, out_ref, *,
                          gamma, total_rows):
    i = pl.program_id(0)
    p = preds_ref[...].astype(jnp.float32)      # (tm, C) cast in-kernel
    labels = labels_ref[...]                    # (tm, 1) int32
    a_t = at_ref[...]                           # (tm, 1) f32 (alpha[label])
    tm, C = p.shape

    # Stable log-sum-exp; log-softmax is never materialized full-width.
    m = jnp.max(p, axis=-1, keepdims=True)
    shifted = p - m
    s = jnp.sum(jnp.exp(shifted), axis=-1, keepdims=True)

    col = lax.broadcasted_iota(jnp.int32, (tm, C), 1)
    onehot = col == labels
    shifted_t = jnp.sum(jnp.where(onehot, shifted, 0.0), axis=-1, keepdims=True)

    logp_t = shifted_t - jnp.log(s)             # (tm, 1)
    p_t = jnp.exp(logp_t)
    one_minus = jnp.maximum(1.0 - p_t, 0.0)
    loss = -a_t * _focal_weight(one_minus, gamma) * logp_t     # (tm, 1)

    # Mask tail rows of the (possibly partial) last block BEFORE summing.
    row = lax.broadcasted_iota(jnp.int32, (tm, 1), 0)
    loss = jnp.where((i * tm + row) < total_rows, loss, 0.0)

    partial = jnp.sum(loss)
    lane = lax.broadcasted_iota(jnp.int32, out_ref.shape, 2)
    out_ref[...] = jnp.where(lane == 0, partial, 0.0)   # scalar in lane 0 only


def _focal_large_c(preds2d, labels1d, a_t1d, C, N, gamma, tile_rows,
                   vmem_budget_bytes, vmem_limit_bytes):
    itemsize = jnp.dtype(preds2d.dtype).itemsize
    lane_c = _round_up(C, 128)

    tm = tile_rows
    if tm is None:
        bytes_per_row = (2 * lane_c * itemsize       # preds, double-buffered
                         + 2 * 2 * 128 * 4           # labels + a_t (lane-padded), dbuf
                         + 3 * lane_c * 4)           # f32 temporaries (no logsoft)
        tm = vmem_budget_bytes // bytes_per_row
        tm = max(8, min(2048, (tm // 8) * 8))
    tm = max(8, (min(tm, _round_up(N, 8)) // 8) * 8)
    # v7x megacore: prefer >= 2 tiles when there is enough data.
    if N > 2 * 8:
        tm = min(tm, _round_up(pl.cdiv(N, 2), 8))

    num_tiles = pl.cdiv(N, tm)

    kernel = functools.partial(_focal_large_c_kernel, gamma=float(gamma),
                               total_rows=N)

    partials = pl.pallas_call(
        kernel,
        out_shape=jax.ShapeDtypeStruct((num_tiles, 1, _LANES), jnp.float32),
        grid_spec=pltpu.PrefetchScalarGridSpec(
            num_scalar_prefetch=0,
            grid=(num_tiles,),
            in_specs=[
                pl.BlockSpec((tm, C), lambda i: (i, 0)),   # preds tile
                pl.BlockSpec((tm, 1), lambda i: (i, 0)),   # labels
                pl.BlockSpec((tm, 1), lambda i: (i, 0)),   # alpha[label]
            ],
            out_specs=pl.BlockSpec((1, 1, _LANES), lambda i: (i, 0, 0)),
        ),
        compiler_params=pltpu.CompilerParams(
            dimension_semantics=("parallel",),
            vmem_limit_bytes=vmem_limit_bytes,
        ),
    )(preds2d, labels1d.reshape(-1, 1), a_t1d.reshape(-1, 1))

    return jnp.sum(partials)


# ----------------------------------------------------------------------------
# Public wrapper.
# ----------------------------------------------------------------------------
def focal_loss_pallas(preds, labels, alpha, *, gamma=2.0, size_average=True,
                      small_c_threshold=32, tile_rows=None,
                      vmem_budget_bytes=16 << 20, vmem_limit_bytes=48 << 20):
    """preds: (..., C) float, labels: (...) int in [0, C). Returns scalar f32.

    VMEM notes: the defaults (16 MiB tiling budget, 48 MiB scoped limit) are
    safe on v5e/v6e (128 MiB) and v7x (64 MiB). On v6e with very large C the
    budget can be raised to ~24 MiB to keep row tiles >= 512.
    """
    C = preds.shape[-1]
    preds2d = preds.reshape(-1, C)                       # keep native dtype
    labels1d = labels.reshape(-1).astype(jnp.int32)
    alpha_vec = jnp.asarray(alpha, dtype=jnp.float32).reshape(C)
    a_t1d = alpha_vec[labels1d]                          # XLA gather, (N,) f32
    N = preds2d.shape[0]

    if C <= small_c_threshold:
        total = _focal_small_c(preds2d, labels1d, a_t1d, C, N, gamma,
                               tile_rows, vmem_budget_bytes, vmem_limit_bytes)
    else:
        total = _focal_large_c(preds2d, labels1d, a_t1d, C, N, gamma,
                               tile_rows, vmem_budget_bytes, vmem_limit_bytes)

    if size_average:
        total = total / jnp.float32(N)
    return total


def focal_loss_reference(preds, labels, alpha, *, gamma=2.0, size_average=True):
    C = preds.shape[-1]
    p2 = preds.reshape(-1, C).astype(jnp.float32)
    lab = labels.reshape(-1).astype(jnp.int32)
    softmax = jax.nn.softmax(p2, axis=1)
    logsoft = jnp.log(softmax)
    p_t = jnp.take_along_axis(softmax, lab[:, None], axis=1)[:, 0]
    logp_t = jnp.take_along_axis(logsoft, lab[:, None], axis=1)[:, 0]
    a_t = jnp.asarray(alpha, dtype=jnp.float32)[lab]
    loss = -a_t * (1.0 - p_t) ** gamma * logp_t
    return jnp.mean(loss) if size_average else jnp.sum(loss)


if __name__ == "__main__":
    # Deterministic parameter init exactly as focal_loss.__init__(alpha=0.25,
    # gamma=2, num_classes=3): alpha = [0.25, 0.75, 0.75].
    num_classes = 3
    alpha_scalar = 0.25
    gamma = 2.0
    alpha = jnp.concatenate([
        jnp.array([alpha_scalar], dtype=jnp.float32),
        jnp.full((num_classes - 1,), 1.0 - alpha_scalar, dtype=jnp.float32),
    ])

    key = jax.random.PRNGKey(0)
    k1, k2, k3, k4, k5, k6 = jax.random.split(key, 6)

    # Case 1: module default C=3, batch=2, seq=23 -> N=46 (lane-dense path,
    # heavily padded/masked single tile).
    preds = jax.random.normal(k1, (2, 23, num_classes), dtype=jnp.float32)
    labels = jax.random.randint(k2, (2, 23), 0, num_classes, dtype=jnp.int32)
    ref = focal_loss_reference(preds, labels, alpha, gamma=gamma)
    out = jax.block_until_ready(focal_loss_pallas(preds, labels, alpha, gamma=gamma))
    assert jnp.allclose(out, ref, rtol=1e-5, atol=1e-6), (out, ref)

    # Case 1b: native bf16 preds — cast to f32 happens inside the kernel.
    ref_bf16 = focal_loss_reference(preds.astype(jnp.bfloat16), labels, alpha,
                                    gamma=gamma)
    out_bf16 = jax.block_until_ready(
        focal_loss_pallas(preds.astype(jnp.bfloat16), labels, alpha, gamma=gamma))
    assert jnp.allclose(out_bf16, ref_bf16, rtol=1e-4, atol=1e-5), (out_bf16, ref_bf16)

    # Case 2: larger N with a forced small tile -> multi-tile lane-dense path
    # with a padded tail (exercises the grid + masking).
    preds2 = jax.random.normal(k3, (2, 600, num_classes), dtype=jnp.float32)
    labels2 = jax.random.randint(k4, (2, 600), 0, num_classes, dtype=jnp.int32)
    ref2 = focal_loss_reference(preds2, labels2, alpha, gamma=gamma)
    out2 = jax.block_until_ready(
        focal_loss_pallas(preds2, labels2, alpha, gamma=gamma, tile_rows=8))
    assert jnp.allclose(out2, ref2, rtol=1e-5, atol=1e-6), (out2, ref2)

    # Case 3: C > 32 (alpha given as a per-class list) -> row-on-sublane path,
    # 2 tiles with a masked partial tail tile.
    C3 = 160
    alpha3 = jnp.linspace(0.1, 0.9, C3, dtype=jnp.float32)
    preds3 = jax.random.normal(k5, (2, 23, C3), dtype=jnp.float32)
    labels3 = jax.random.randint(k6, (2, 23), 0, C3, dtype=jnp.int32)
    ref3 = focal_loss_reference(preds3, labels3, alpha3, gamma=gamma)
    out3 = jax.block_until_ready(
        focal_loss_pallas(preds3, labels3, alpha3, gamma=gamma))
    assert jnp.allclose(out3, ref3, rtol=1e-5, atol=1e-6), (out3, ref3)

    print("KERNEL_OK")
</pallas_src>

<mosaic_0001>
module attributes {stable_mosaic.version = 11 : i64} {
  func.func @_focal_small_c_kernel(%arg0: i32, %arg1: memref<3x8x128xf32, #tpu.memory_space<vmem>>, %arg2: memref<8x128xi32, #tpu.memory_space<vmem>>, %arg3: memref<8x128xf32, #tpu.memory_space<vmem>>, %arg4: memref<1x1x128xf32, #tpu.memory_space<vmem>>) attributes {dimension_semantics = [#tpu.dimension_semantics<parallel>], iteration_bounds = array<i64: 1>, scalar_prefetch = 0 : i64, scratch_operands = 0 : i64, tpu.core_type = #tpu.core_type<tc>, window_params = [{transform_indices = @transform_0, window_bounds = array<i64: 3, 8, 128>}, {transform_indices = @transform_1, window_bounds = array<i64: 8, 128>}, {transform_indices = @transform_2, window_bounds = array<i64: 8, 128>}, {transform_indices = @transform_3, window_bounds = array<i64: 1, 1, 128>}]} {
    %c0 = arith.constant 0 : index
    %c0_0 = arith.constant 0 : index
    %0 = vector.load %arg2[%c0, %c0_0] : memref<8x128xi32, #tpu.memory_space<vmem>>, vector<8x128xi32>
    %c0_1 = arith.constant 0 : index
    %c0_2 = arith.constant 0 : index
    %1 = vector.load %arg3[%c0_1, %c0_2] : memref<8x128xf32, #tpu.memory_space<vmem>>, vector<8x128xf32>
    %c0_3 = arith.constant 0 : index
    %c0_4 = arith.constant 0 : index
    %c0_5 = arith.constant 0 : index
    %2 = vector.load %arg1[%c0_3, %c0_4, %c0_5] : memref<3x8x128xf32, #tpu.memory_space<vmem>>, vector<1x8x128xf32>
    %3 = vector.shape_cast %2 : vector<1x8x128xf32> to vector<8x128xf32>
    %c1 = arith.constant 1 : index
    %c0_6 = arith.constant 0 : index
    %c0_7 = arith.constant 0 : index
    %4 = vector.load %arg1[%c1, %c0_6, %c0_7] : memref<3x8x128xf32, #tpu.memory_space<vmem>>, vector<1x8x128xf32>
    %5 = vector.shape_cast %4 : vector<1x8x128xf32> to vector<8x128xf32>
    %6 = arith.maximumf %3, %5 : vector<8x128xf32>
    %c2 = arith.constant 2 : index
    %c0_8 = arith.constant 0 : index
    %c0_9 = arith.constant 0 : index
    %7 = vector.load %arg1[%c2, %c0_8, %c0_9] : memref<3x8x128xf32, #tpu.memory_space<vmem>>, vector<1x8x128xf32>
    %8 = vector.shape_cast %7 : vector<1x8x128xf32> to vector<8x128xf32>
    %9 = arith.maximumf %6, %8 : vector<8x128xf32>
    %cst = arith.constant 0.000000e+00 : f32
    %10 = vector.broadcast %cst : f32 to vector<8x128xf32>
    %cst_10 = arith.constant 0.000000e+00 : f32
    %11 = vector.broadcast %cst_10 : f32 to vector<8x128xf32>
    %c0_11 = arith.constant 0 : index
    %c0_12 = arith.constant 0 : index
    %c0_13 = arith.constant 0 : index
    %12 = vector.load %arg1[%c0_11, %c0_12, %c0_13] : memref<3x8x128xf32, #tpu.memory_space<vmem>>, vector<1x8x128xf32>
    %13 = vector.shape_cast %12 : vector<1x8x128xf32> to vector<8x128xf32>
    %14 = arith.subf %13, %9 : vector<8x128xf32>
    %15 = math.exp %14 : vector<8x128xf32>
    %16 = arith.addf %10, %15 : vector<8x128xf32>
    %c0_i32 = arith.constant 0 : i32
    %17 = vector.broadcast %c0_i32 : i32 to vector<8x128xi32>
    %18 = arith.cmpi eq, %0, %17 : vector<8x128xi32>
    %19 = arith.select %18, %14, %11 : vector<8x128xi1>, vector<8x128xf32>
    %c1_14 = arith.constant 1 : index
    %c0_15 = arith.constant 0 : index
    %c0_16 = arith.constant 0 : index
    %20 = vector.load %arg1[%c1_14, %c0_15, %c0_16] : memref<3x8x128xf32, #tpu.memory_space<vmem>>, vector<1x8x128xf32>
    %21 = vector.shape_cast %20 : vector<1x8x128xf32> to vector<8x128xf32>
    %22 = arith.subf %21, %9 : vector<8x128xf32>
    %23 = math.exp %22 : vector<8x128xf32>
    %24 = arith.addf %16, %23 : vector<8x128xf32>
    %c1_i32 = arith.constant 1 : i32
    %25 = vector.broadcast %c1_i32 : i32 to vector<8x128xi32>
    %26 = arith.cmpi eq, %0, %25 : vector<8x128xi32>
    %27 = arith.select %26, %22, %19 : vector<8x128xi1>, vector<8x128xf32>
    %c2_17 = arith.constant 2 : index
    %c0_18 = arith.constant 0 : index
    %c0_19 = arith.constant 0 : index
    %28 = vector.load %arg1[%c2_17, %c0_18, %c0_19] : memref<3x8x128xf32, #tpu.memory_space<vmem>>, vector<1x8x128xf32>
    %29 = vector.shape_cast %28 : vector<1x8x128xf32> to vector<8x128xf32>
    %30 = arith.subf %29, %9 : vector<8x128xf32>
    %31 = math.exp %30 : vector<8x128xf32>
    %32 = arith.addf %24, %31 : vector<8x128xf32>
    %c2_i32 = arith.constant 2 : i32
    %33 = vector.broadcast %c2_i32 : i32 to vector<8x128xi32>
    %34 = arith.cmpi eq, %0, %33 : vector<8x128xi32>
    %35 = arith.select %34, %30, %27 : vector<8x128xi1>, vector<8x128xf32>
    %36 = math.log %32 : vector<8x128xf32>
    %37 = arith.subf %35, %36 : vector<8x128xf32>
    %38 = math.exp %37 : vector<8x128xf32>
    %cst_20 = arith.constant 1.000000e+00 : f32
    %39 = vector.broadcast %cst_20 : f32 to vector<8x128xf32>
    %40 = arith.subf %39, %38 : vector<8x128xf32>
    %cst_21 = arith.constant 0.000000e+00 : f32
    %41 = vector.broadcast %cst_21 : f32 to vector<8x128xf32>
    %42 = arith.maximumf %40, %41 : vector<8x128xf32>
    %cst_22 = arith.constant 0.000000e+00 : f32
    %43 = vector.broadcast %cst_22 : f32 to vector<8x128xf32>
    %44 = arith.subf %43, %1 : vector<8x128xf32>
    %45 = arith.mulf %42, %42 : vector<8x128xf32>
    %46 = arith.mulf %44, %45 : vector<8x128xf32>
    %47 = arith.mulf %46, %37 : vector<8x128xf32>
    %48 = tpu.iota {dimensions = array<i32: 0>} : vector<8x128xi32>
    %49 = tpu.iota {dimensions = array<i32: 1>} : vector<8x128xi32>
    %c8_i32 = arith.constant 8 : i32
    %50 = arith.muli %arg0, %c8_i32 : i32
    %51 = vector.broadcast %50 : i32 to vector<8x128xi32>
    %52 = arith.addi %51, %48 : vector<8x128xi32>
    %c128_i32 = arith.constant 128 : i32
    %53 = vector.broadcast %c128_i32 : i32 to vector<8x128xi32>
    %54 = arith.muli %52, %53 : vector<8x128xi32>
    %55 = arith.addi %54, %49 : vector<8x128xi32>
    %c46_i32 = arith.constant 46 : i32
    %56 = vector.broadcast %c46_i32 : i32 to vector<8x128xi32>
    %57 = arith.cmpi slt, %55, %56 : vector<8x128xi32>
    %cst_23 = arith.constant 0.000000e+00 : f32
    %58 = vector.broadcast %cst_23 : f32 to vector<8x128xf32>
    %59 = arith.select %57, %47, %58 : vector<8x128xi1>, vector<8x128xf32>
    %cst_24 = arith.constant dense<0.000000e+00> : vector<128xf32>
    %60 = vector.multi_reduction <add>, %59, %cst_24 [0] : vector<8x128xf32> to vector<128xf32>
    %61 = vector.shape_cast %60 : vector<128xf32> to vector<1x1x128xf32>
    %c0_25 = arith.constant 0 : index
    %c0_26 = arith.constant 0 : index
    %c0_27 = arith.constant 0 : index
    %62 = vector.load %arg4[%c0_25, %c0_26, %c0_27] : memref<1x1x128xf32, #tpu.memory_space<vmem>>, vector<1x1x128xf32>
    tpu.vector_store %arg4[%c0_25, %c0_26, %c0_27], %61 {strides = array<i32>} : memref<1x1x128xf32, #tpu.memory_space<vmem>>, vector<1x1x128xf32>,
    return
  }
  func.func @transform_0(%arg0: i32) -> (i32, i32, i32) {
    %c0_i32 = arith.constant 0 : i32
    %c0_i32_0 = arith.constant 0 : i32
    %c0_i32_1 = arith.constant 0 : i32
    return %c0_i32, %arg0, %c0_i32_0 : i32, i32, i32
  }
  func.func @transform_1(%arg0: i32) -> (i32, i32) {
    %c0_i32 = arith.constant 0 : i32
    %c0_i32_0 = arith.constant 0 : i32
    return %arg0, %c0_i32 : i32, i32
  }
  func.func @transform_2(%arg0: i32) -> (i32, i32) {
    %c0_i32 = arith.constant 0 : i32
    %c0_i32_0 = arith.constant 0 : i32
    return %arg0, %c0_i32 : i32, i32
  }
  func.func @transform_3(%arg0: i32) -> (i32, i32, i32) {
    %c0_i32 = arith.constant 0 : i32
    %c0_i32_0 = arith.constant 0 : i32
    %c0_i32_1 = arith.constant 0 : i32
    return %arg0, %c0_i32, %c0_i32_0 : i32, i32, i32
  }
}

</mosaic_0001>

<bundles_post_ra>
// kernel: tpu_custom_call.1
= control target key start
LH: loop header
LB: loop body
LE: loop exit
PB: predicated region body
PF: predicated region fallthrough
CT: control target
= control target key end

     0   :  { %8 = vsyncpa [#allocation3], 0  ;;  %s315_s0 = inlined_call_operand.hbm [shape: f32[3,8,128], index: 0, kind: input, shape index: {}]   ;;  %s316_s1 = inlined_call_operand.hbm [shape: s32[8,128], index: 1, kind: input, shape index: {}]   ;;  %s317_s2 = inlined_call_operand.hbm [shape: f32[8,128], index: 2, kind: input, shape index: {}]   ;;  %s318_s3 = inlined_call_operand.hbm [shape: f32[1,1,128], index: 3, kind: output, shape index: {}]  }
   0x1   :  { %9 = vsyncpa [#allocation6], 0 }
   0x2   :  { %10 = vsyncpa [#allocation4], 0  ;;  %s234_s12 = smov [#allocation5]   ;;  %s235_s14 = smov [#allocation2]  }
   0x3   :  { %s29_s13 = sshll.u32 %s234_s12, 4  ;;  %s16_s15 = sshll.u32 %s235_s14, 4  ;;  %s30_s13 = int_to_ptr.vmem [resolvable:$true] %s29_s13  ;;  %s260_s15 = int_to_ptr.vmem [resolvable:$true] %s16_s15 }
   0x4   :  { %s140_s18 = scalar_lea.hbm %s316_s1, 128 }
   0x5   :  { %p141_p0 = scmp.ne.s32.totalorder %s316_s1, %s140_s18  ;;  %p144_p1 = scmp.lt.u32.totalorder %s140_s18, %s316_s1 }
   0x7   :  { %p146_p2 = pnand %p144_p1, %p141_p0 }
   0x9   :  { %149 = shalt.err (!%p146_p2)
}
   0xa   :  { %s150_s23 = scalar_lea.vmem %s30_s13, 128  ;;  %p155_p4 = scmp.lt.s32.totalorder %s30_s13, %s30_s13 }
   0xb   :  { %p151_p3 = scmp.ne.s32.totalorder %s30_s13, %s150_s23  ;;  %p156_p5 = scmp.lt.s32.totalorder %s150_s23, %s150_s23 }
   0xd   :  { %p157_p6 = por %p156_p5, %p155_p4 }
   0xf   :  { %p158_p7 = pnand %p157_p6, %p151_p3 }
  0x11   :  { %161 = shalt.err (!%p158_p7)
}
  0x12   :  { %32 = dma.hbm_to_vmem [thread:$0]  %s316_s1, 128, %s30_s13, [#allocation6]  }
  0x13   :  { %s162_s28 = scalar_lea.hbm %s315_s0, 384 }
  0x14   :  { %p163_p8 = scmp.ne.s32.totalorder %s315_s0, %s162_s28  ;;  %p166_p9 = scmp.lt.u32.totalorder %s162_s28, %s315_s0 }
  0x16   :  { %p168_p10 = pnand %p166_p9, %p163_p8 }
  0x18   :  { %171 = shalt.err (!%p168_p10)
}
  0x19   :  { %s172_s6 = scalar_lea.vmem %s260_s15, 384  ;;  %p177_p12 = scmp.lt.s32.totalorder %s260_s15, %s260_s15 }
  0x1a   :  { %p173_p11 = scmp.ne.s32.totalorder %s260_s15, %s172_s6  ;;  %p178_p13 = scmp.lt.s32.totalorder %s172_s6, %s172_s6 }
  0x1c   :  { %p179_p0 = por %p178_p13, %p177_p12 }
  0x1e   :  { %p180_p1 = pnand %p179_p0, %p173_p11 }
  0x20   :  { %183 = shalt.err (!%p180_p1)
}
  0x21   :  { %s236_s1 = smov 128   ;;  %s237_s7 = smov 8  }
  0x22   :  { %22 = dma.hbm_to_vmem [thread:$0]  %s315_s0, 384, %s260_s15, [#allocation3], %s236_s1, %s236_s1, %s237_s7  }
  0x23   :  { %s238_s10 = smov [#allocation7]   ;;  %s184_s14 = scalar_lea.hbm %s317_s2, 128 }
  0x24   :  { %s39_s11 = sshll.u32 %s238_s10, 4  ;;  %p185_p2 = scmp.ne.s32.totalorder %s317_s2, %s184_s14  ;;  %s40_s11 = int_to_ptr.vmem [resolvable:$true] %s39_s11 }
  0x25   :  { %p188_p3 = scmp.lt.u32.totalorder %s184_s14, %s317_s2 }
  0x27   :  { %p190_p4 = pnand %p188_p3, %p185_p2 }
  0x29   :  { %193 = shalt.err (!%p190_p4)
}
  0x2a   :  { %s194_s20 = scalar_lea.vmem %s40_s11, 128  ;;  %p199_p6 = scmp.lt.s32.totalorder %s40_s11, %s40_s11 }
  0x2b   :  { %p195_p5 = scmp.ne.s32.totalorder %s40_s11, %s194_s20  ;;  %p200_p7 = scmp.lt.s32.totalorder %s194_s20, %s194_s20 }
  0x2d   :  { %p201_p8 = por %p200_p7, %p199_p6 }
  0x2f   :  { %p202_p9 = pnand %p201_p8, %p195_p5 }
  0x31   :  { %205 = shalt.err (!%p202_p9)
}
  0x32   :  { %42 = dma.hbm_to_vmem [thread:$0]  %s317_s2, 128, %s40_s11, [#allocation6]  }
  0x33   :  { %228 = dma.done.wait [#allocation3], 384  }
  0x34   :  { %229 = vsyncadd [#allocation3], 4294966912 }
  0x35   :  { %230 = dma.done.wait [#allocation6], 256  }
  0x36   :  { %231 = vsyncadd [#allocation6], 4294967040  ;;  %v54_v0 = vld [vmem:[#allocation2] sm:$0xff]  ;;  %v56_v1 = vld [vmem:[#allocation2 + $0x8] sm:$0xff]  ;;  %v90_v24 = vlaneseq  ;;  %s239_s2 = smov [#allocation8]  }
  0x37   :  { %v59_v2 = vld [vmem:[#allocation2 + $0x10] sm:$0xff]  ;;  %v57_v3 = vmax.f32 %v54_v0, %v56_v1  ;;  %v52_v15 = vld [vmem:[#allocation5] sm:$0xff]  ;;  %v53_v27 = vld [vmem:[#allocation7] sm:$0xff]  ;;  %s114_s21 = sshll.u32 %s239_s2, 4  ;;  %s115_s21 = int_to_ptr.vmem [resolvable:$true] %s114_s21 }
  0x38   :  { %vm65_vm0 = vcmp.eq.s32.totalorder %v52_v15, 0  ;;  %vm71_vm1 = vcmp.eq.s32.totalorder %v52_v15, 1  ;;  %vm77_vm2 = vcmp.eq.s32.totalorder %v52_v15, 2  ;;  %v91_v25 = vshrl.u32 %v90_v24, 7  ;;  %s206_s22 = scalar_lea.vmem %s115_s21, 16  ;;  %s210_s23 = scalar_lea.vmem %s115_s21, 32 }
  0x39   :  { %v60_v4 = vmax.f32 %v57_v3, %v59_v2  ;;  %v93_v28 = vand.u32 127, %v90_v24  ;;  %v86_v32 = vsub.f32 0.0, %v53_v27  ;;  %p207_p10 = scmp.ne.s32.totalorder %s115_s21, %s206_s22  ;;  %p211_p11 = scmp.lt.s32.totalorder %s115_s21, %s115_s21 }
  0x3a   :  { %v97_v29 = vmul.u32 128, %v91_v25  ;;  %p212_p12 = scmp.lt.s32.totalorder %s210_s23, %s206_s22 }
  0x3b   :  { %v61_v5 = vsub.f32 %v54_v0, %v60_v4  ;;  %v67_v6 = vsub.f32 %v56_v1, %v60_v4  ;;  %v73_v7 = vsub.f32 %v59_v2, %v60_v4 }
  0x3c   :  { %v98_v33 = vadd.s32 %v97_v29, %v93_v28  ;;  %p213_p13 = por %p212_p12, %p211_p11 }
  0x3d   :  { %v62_v8 = vmul.f32 1.442695, %v61_v5  ;;  %v68_v9 = vmul.f32 1.442695, %v67_v6  ;;  %v74_v10 = vmul.f32 1.442695, %v73_v7 }
  0x3e   :  { %v66_v17 = vsel %vm65_vm0, %v61_v5, 0.0  ;;  %vm99_vm3 = vcmp.lt.s32.totalorder %v98_v33, 46  ;;  %p214_p0 = pnand %p213_p13, %p207_p10 }
  0x3f   :  { %130 = vpow2.f32 %v62_v8  ;;  %v72_v18 = vsel %vm71_vm1, %v67_v6, %v66_v17 }
  0x40   :  { %132 = vpow2.f32 %v68_v9  ;;  %v78_v20 = vsel %vm77_vm2, %v73_v7, %v72_v18 }
  0x41   :  { %134 = vpow2.f32 %v74_v10 }
  0x49   :  { %v131_v11 = vpop.eup %130 }
  0x4a   :  { %v133_v12 = vpop.eup %132 }
  0x4b   :  { %v135_v13 = vpop.eup %134  ;;  %v70_v14 = vadd.f32 %v133_v12, %v131_v11 }
  0x4d   :  { %v76_v16 = vadd.f32 %v135_v13, %v70_v14 }
  0x4f   :  { %136 = vlog2.f32 %v76_v16 }
  0x59   :  { %v137_v19 = vpop.eup %136 }
  0x5a   :  { %v80_v21 = vmul.f32 0.6931472, %v137_v19 }
  0x5c   :  { %v81_v22 = vsub.f32 %v78_v20, %v80_v21 }
  0x5e   :  { %v82_v23 = vmul.f32 1.442695, %v81_v22 }
  0x60   :  { %138 = vpow2.f32 %v82_v23 }
  0x6a   :  { %v139_v26 = vpop.eup %138 }
  0x6b   :  { %v84_v30 = vsub.f32 1.0, %v139_v26 }
  0x6d   :  { %v85_v31 = vmax.f32 %v84_v30, 0.0 }
  0x6f   :  { %v87_v34 = vmul.f32 %v85_v31, %v85_v31 }
  0x71   :  { %v88_v35 = vmul.f32 %v87_v34, %v86_v32 }
  0x73   :  { %v89_v36 = vmul.f32 %v88_v35, %v81_v22 }
  0x75   :  { %v100_v37 = vsel %vm99_vm3, %v89_v36, 0.0 }
  0x76   :  { %v101_v38 = vrot.slane %v100_v37, 4 }
  0x78   :  { %v102_v39 = vadd.f32 %v101_v38, %v100_v37 }
  0x7a   :  { %v103_v40 = vrot.slane %v102_v39, 2 }
  0x7c   :  { %v104_v41 = vadd.f32 %v103_v40, %v102_v39 }
  0x7e   :  { %v105_v42 = vrot.slane %v104_v41, 1 }
  0x80   :  { %v106_v43 = vadd.f32 %v105_v42, %v104_v41 }
  0x82   :  { %107 = vst [vmem:[#allocation8] sm:$0x1] %v106_v43 }
  0x83   :  { %217 = shalt.err (!%p214_p0)
}
  0x84   :  { %s218_s26 = scalar_lea.hbm %s318_s3, 16 }
  0x85   :  { %p219_p1 = scmp.ne.s32.totalorder %s318_s3, %s218_s26  ;;  %p222_p2 = scmp.lt.u32.totalorder %s218_s26, %s318_s3 }
  0x87   :  { %p224_p3 = pnand %p222_p2, %p219_p1 }
  0x89   :  { %227 = shalt.err (!%p224_p3)
}
  0x8a   :  { %117 = dma.vmem_to_hbm [thread:$0]  %s115_s21, 16, %s318_s3, [#allocation4]  }
  0x8b   :  { %232 = dma.done.wait [#allocation4], 16  }
  0x8c   :  { %233 = vsyncadd [#allocation4], 4294967280 }
  0x8d   :  { %121 = vsyncpa [#allocation3], 1 }
  0x8e   :  { %122 = vsyncpa [#allocation6], 1 }
  0x8f   :  { %123 = vsyncpa [#allocation4], 1 }

</bundles_post_ra>
